<compile_context>
chip_gen: v7x
topology: tpu7x:2x2x1
jax: 0.10.0
libtpu: 0.0.40
codegen_flags: <defaults>
</compile_context>

<pallas_src>
import numpy as np
import jax
import jax.numpy as jnp
from jax.experimental import pallas as pl
from jax.experimental.pallas import tpu as pltpu

L_MAX = 3  # GRUS_1 reference supports path lengths 1..3


def _fast_sigmoid(x):
    # sigmoid(x) == 0.5 * (tanh(x/2) + 1): one EUP op instead of exp + divide.
    return 0.5 * (jnp.tanh(0.5 * x) + 1.0)


# ----------------------------------------------------------------------------
# Fused Pallas kernel (one P-row tile per grid step)
# ----------------------------------------------------------------------------
def _fused_gru_kernel(ids_ref, tab_ref, whh_ref, bhn_ref, out_ref):
    """Fused GRU path encoder.

    ids_ref : [L_MAX+1, TP, 1] int32  rows 0..L_MAX-1: per-step relation ids
                                      (padded with rel_pad); row L_MAX: tail_loc.
    tab_ref : [R, 3H] f32/bf16  rel_emb @ [Wih_r|Wih_z|Wih_n] + [b_r|b_z|b_in]
    whh_ref : [H, 3H] f32/bf16  [Whh_r|Whh_z|Whh_n]
    bhn_ref : [1, H]  f32       b_hh_n (stays inside the r * (.) term)
    out_ref : [TP, H] f32       hidden state at step tail_loc[p]
    """
    p_rows, hidden = out_ref.shape
    r_rows = tab_ref.shape[0]

    tab = tab_ref[...]
    whh = whh_ref[...]
    mxu_dtype = tab.dtype
    tail = ids_ref[L_MAX]                                        # [TP, 1] int32

    # Hoisted input-side work for all steps: the embedding gather is fused with the
    # (pre-folded) input projection -> one small matmul per step, 3H-wide output.
    # NOTE: any relation id outside [0, R) silently maps to a zero row (no bias);
    # upstream ids are always in range (rel_pad included as the last table row).
    iota = jax.lax.broadcasted_iota(jnp.int32, (p_rows, r_rows), 1)
    gi = []
    for t in range(L_MAX):
        onehot = (ids_ref[t] == iota).astype(mxu_dtype)          # [TP, R]
        gi.append(jnp.dot(onehot, tab, preferred_element_type=jnp.float32))  # [TP, 3H]

    # Hoisted broadcast (JAX does not CSE broadcast_in_dim inside the unrolled loop).
    b_hn = jnp.broadcast_to(bhn_ref[...], (p_rows, hidden))

    h = jnp.zeros((p_rows, hidden), jnp.float32)
    out = jnp.zeros((p_rows, hidden), jnp.float32)
    for t in range(L_MAX):                                       # unrolled, L_MAX = 3
        gh = jnp.dot(h.astype(mxu_dtype), whh,
                     preferred_element_type=jnp.float32)         # [TP, 3H], 1 MXU op
        r = _fast_sigmoid(gi[t][:, 0:hidden] + gh[:, 0:hidden])
        z = _fast_sigmoid(gi[t][:, hidden:2 * hidden] + gh[:, hidden:2 * hidden])
        n = jnp.tanh(gi[t][:, 2 * hidden:3 * hidden]
                     + r * (gh[:, 2 * hidden:3 * hidden] + b_hn))
        h = (1.0 - z) * n + z * h
        out = jnp.where(tail == t, h, out)                       # select h at tail_loc
    out_ref[...] = out.astype(out_ref.dtype)


def fused_gru_paths(ids_packed, rel_gi, whh_cat, b_hn, *, block_rows=512):
    lp1, p_pad, _ = ids_packed.shape
    r_rows, three_h = rel_gi.shape
    h_dim = three_h // 3
    tp = min(block_rows, p_pad)
    assert p_pad % tp == 0 and tp % 8 == 0
    grid = (p_pad // tp,)
    return pl.pallas_call(
        _fused_gru_kernel,
        out_shape=jax.ShapeDtypeStruct((p_pad, h_dim), jnp.float32),
        grid=grid,
        in_specs=[
            pl.BlockSpec((lp1, tp, 1), lambda i: (0, i, 0)),      # tiled over P
            pl.BlockSpec((r_rows, three_h), lambda i: (0, 0)),    # resident table
            pl.BlockSpec((h_dim, three_h), lambda i: (0, 0)),     # resident weights
            pl.BlockSpec((1, h_dim), lambda i: (0, 0)),
        ],
        out_specs=pl.BlockSpec((tp, h_dim), lambda i: (i, 0)),
        compiler_params=pltpu.CompilerParams(
            dimension_semantics=("parallel",)),                   # megacore on v7x
    )(ids_packed, rel_gi, whh_cat, b_hn)


# ----------------------------------------------------------------------------
# Parameter prep (host side, one-time): gate-fused weights + folded rel table.
# ----------------------------------------------------------------------------
def prepare_gru_params(w_ih, w_hh, b_ih, b_hh, rel_emb, *, mxu_dtype=jnp.float32):
    """PyTorch GRUCell layout: w_ih [3H, E], w_hh [3H, H], biases [3H], gates (r,z,n).

    Folds the embedding gather + input projection + input-side biases into one table:
      rel_gi[r] = rel_emb[r] @ [Wih_r^T | Wih_z^T | Wih_n^T] + [b_r | b_z | b_in]
    with b_r = b_ih_r + b_hh_r, b_z = b_ih_z + b_hh_z, b_in = b_ih_n.
    b_hh_n is kept separate (it sits inside the r*(.) term of the GRU).
    Set mxu_dtype=jnp.bfloat16 for native-rate MXU operands on v6e/v7x.
    """
    h = w_hh.shape[1]
    wih_cat = jnp.concatenate([w_ih[g * h:(g + 1) * h].T for g in range(3)], axis=1)  # [E,3H]
    whh_cat = jnp.concatenate([w_hh[g * h:(g + 1) * h].T for g in range(3)], axis=1)  # [H,3H]
    b_r = b_ih[0:h] + b_hh[0:h]
    b_z = b_ih[h:2 * h] + b_hh[h:2 * h]
    b_in = b_ih[2 * h:3 * h]
    bias_cat = jnp.concatenate([b_r, b_z, b_in])[None, :]                              # [1,3H]
    rel_gi = jnp.dot(rel_emb.astype(jnp.float32), wih_cat,
                     precision=jax.lax.Precision.HIGHEST) + bias_cat                   # [R,3H]
    b_hn = b_hh[2 * h:3 * h][None, :]                                                  # [1,H]
    return rel_gi.astype(mxu_dtype), whh_cat.astype(mxu_dtype), b_hn.astype(jnp.float32)


# ----------------------------------------------------------------------------
# GRUS_1 forward.  Ragged Python-list bookkeeping stays as host-side glue;
# everything numeric runs in ONE Pallas kernel (tiled over path rows).
# ----------------------------------------------------------------------------
def grus1_forward(support_path, support_pair, ent_emb, rel_emb, gru_params, *,
                  block_rows=512):
    # NOTE: the reference computes t_h = ent_emb(tail) - ent_emb(head) and then discards
    # it (t_h_new is reset to None before returning) -> dead work, deliberately dropped.
    _ = (support_pair, ent_emb)

    rel_gi, whh_cat, b_hn = gru_params
    rel_pad = rel_emb.shape[0] - 1

    groups = [g for g in support_path if len(g) != 0]
    if len(groups) == 0:
        return None, [], None
    sizes = [len(g) for g in groups]
    p_total = sum(sizes)

    p8 = max(8, -(-p_total // 8) * 8)        # f32 sublane multiple
    tp = min(block_rows, p8)
    p_pad = -(-p_total // tp) * tp           # pad path batch to a whole number of blocks

    # TODO(synk): ragged Python-list filtering/padding has no clean in-kernel equivalent
    # (shapes depend on the input list structure); it stays as host-side glue.
    ids = np.full((L_MAX + 1, p_pad, 1), rel_pad, dtype=np.int32)
    ids[L_MAX, :, 0] = 0
    row = 0
    for group in groups:
        for path in group:
            assert 1 <= len(path) <= L_MAX
            ids[:len(path), row, 0] = path
            ids[L_MAX, row, 0] = len(path) - 1
            row += 1
    ids = jnp.asarray(ids)

    out = fused_gru_paths(ids, rel_gi, whh_cat, b_hn, block_rows=block_rows)
    tail_emb_all = out[:p_total]

    tail_emb = []
    off = 0
    for sz in sizes:
        tail_emb.append(tail_emb_all[off:off + sz])
        off += sz
    return tail_emb_all, tail_emb, None      # t_h_new is None in the reference


# ----------------------------------------------------------------------------
# Pure-JAX reference (mirrors the PyTorch module) for correctness checking.
# ----------------------------------------------------------------------------
def gru_cell_ref(x, h, w_ih, w_hh, b_ih, b_hh):
    gi = x @ w_ih.T + b_ih
    gh = h @ w_hh.T + b_hh
    hd = h.shape[1]
    r = jax.nn.sigmoid(gi[:, :hd] + gh[:, :hd])
    z = jax.nn.sigmoid(gi[:, hd:2 * hd] + gh[:, hd:2 * hd])
    n = jnp.tanh(gi[:, 2 * hd:] + r * gh[:, 2 * hd:])
    return (1.0 - z) * n + z * h


def grus1_forward_ref(support_path, rel_emb, w_ih, w_hh, b_ih, b_hh, hidden_dim):
    rel_pad = rel_emb.shape[0] - 1
    groups = [g for g in support_path if len(g) != 0]
    tail_emb = []
    for group in groups:
        lay = max(len(p) for p in group)
        padded = np.full((len(group), lay), rel_pad, dtype=np.int32)
        tail_loc = np.zeros(len(group), dtype=np.int32)
        for j, p in enumerate(group):
            padded[j, :len(p)] = p
            tail_loc[j] = len(p) - 1
        h = jnp.zeros((len(group), hidden_dim), jnp.float32)
        updates = []
        for step in range(lay):
            x = rel_emb[jnp.asarray(padded[:, step])]
            h = gru_cell_ref(x, h, w_ih, w_hh, b_ih, b_hh)
            updates.append(h)
        cat = jnp.stack(updates, axis=1)
        tail_emb.append(cat[jnp.arange(len(group)), jnp.asarray(tail_loc)])
    return jnp.concatenate(tail_emb, axis=0) if tail_emb else None


if __name__ == "__main__":
    embed_dim = 32
    hidden_dim = 32
    num_ent = 20
    num_rel = 10          # real relations 0..9; rel_pad = 10 (extra padding row)

    key = jax.random.PRNGKey(0)
    k1, k2, k3, k4, k5, k6 = jax.random.split(key, 6)

    ent_emb = jax.random.normal(k1, (num_ent, embed_dim), jnp.float32)
    rel_emb = jax.random.normal(k2, (num_rel + 1, embed_dim), jnp.float32)

    bound = 1.0 / np.sqrt(hidden_dim)
    w_ih = jax.random.uniform(k3, (3 * hidden_dim, embed_dim), jnp.float32, -bound, bound)
    w_hh = jax.random.uniform(k4, (3 * hidden_dim, hidden_dim), jnp.float32, -bound, bound)
    b_ih = jax.random.uniform(k5, (3 * hidden_dim,), jnp.float32, -bound, bound)
    b_hh = jax.random.uniform(k6, (3 * hidden_dim,), jnp.float32, -bound, bound)

    params_f32 = prepare_gru_params(w_ih, w_hh, b_ih, b_hh, rel_emb, mxu_dtype=jnp.float32)
    params_bf16 = prepare_gru_params(w_ih, w_hh, b_ih, b_hh, rel_emb, mxu_dtype=jnp.bfloat16)

    # ---- small ragged case (mirrors the reference module usage) ----------------
    support_pair = [[0, 5], [1, 6], [2, 7]]
    support_path = [
        [[1, 2], [3]],
        [],                         # empty group -> filtered out
        [[4, 5, 6], [7], [2, 3]],
    ]

    tail_emb_all, tail_emb, t_h_new = grus1_forward(
        support_path, support_pair, ent_emb, rel_emb, params_f32)
    tail_emb_all = jax.block_until_ready(tail_emb_all)

    assert tail_emb_all.shape == (5, hidden_dim), tail_emb_all.shape
    assert t_h_new is None
    assert [t.shape[0] for t in tail_emb] == [2, 3]

    want = grus1_forward_ref(support_path, rel_emb, w_ih, w_hh, b_ih, b_hh, hidden_dim)
    np.testing.assert_allclose(np.asarray(tail_emb_all), np.asarray(want),
                               rtol=1e-4, atol=1e-4)

    # ---- larger case: exercises the P-tiled grid (4 parallel blocks of 64 rows) ----
    rng = np.random.RandomState(0)
    big_path = []
    for _ in range(16):
        group = []
        for _ in range(16):
            ln = int(rng.randint(1, L_MAX + 1))
            group.append([int(r) for r in rng.randint(0, num_rel, size=ln)])
        big_path.append(group)
    big_pair = [[int(rng.randint(num_ent)), int(rng.randint(num_ent))] for _ in range(16)]
    want_big = grus1_forward_ref(big_path, rel_emb, w_ih, w_hh, b_ih, b_hh, hidden_dim)

    big_f32, _, _ = grus1_forward(big_path, big_pair, ent_emb, rel_emb,
                                  params_f32, block_rows=64)
    big_f32 = jax.block_until_ready(big_f32)
    np.testing.assert_allclose(np.asarray(big_f32), np.asarray(want_big),
                               rtol=1e-4, atol=1e-4)

    # bf16 MXU-operand variant (native MXU dtype on v6e/v7x): looser tolerance.
    big_bf16, _, _ = grus1_forward(big_path, big_pair, ent_emb, rel_emb,
                                   params_bf16, block_rows=64)
    big_bf16 = jax.block_until_ready(big_bf16)
    np.testing.assert_allclose(np.asarray(big_bf16), np.asarray(want_big),
                               rtol=5e-2, atol=5e-2)

    print("KERNEL_OK")
</pallas_src>

<mosaic_0001>
module attributes {stable_mosaic.version = 11 : i64} {
  func.func @_fused_gru_kernel(%arg0: i32, %arg1: memref<4x8x1xi32, #tpu.memory_space<vmem>>, %arg2: memref<11x96xf32, #tpu.memory_space<vmem>>, %arg3: memref<32x96xf32, #tpu.memory_space<vmem>>, %arg4: memref<1x32xf32, #tpu.memory_space<vmem>>, %arg5: memref<8x32xf32, #tpu.memory_space<vmem>>) attributes {dimension_semantics = [#tpu.dimension_semantics<parallel>], iteration_bounds = array<i64: 1>, scalar_prefetch = 0 : i64, scratch_operands = 0 : i64, tpu.core_type = #tpu.core_type<tc>, window_params = [{transform_indices = @transform_0, window_bounds = array<i64: 4, 8, 1>}, {pipeline_mode = #tpu.pipeline_mode<synchronous>, transform_indices = @transform_1, window_bounds = array<i64: 11, 96>}, {pipeline_mode = #tpu.pipeline_mode<synchronous>, transform_indices = @transform_2, window_bounds = array<i64: 32, 96>}, {pipeline_mode = #tpu.pipeline_mode<synchronous>, transform_indices = @transform_3, window_bounds = array<i64: 1, 32>}, {transform_indices = @transform_4, window_bounds = array<i64: 8, 32>}]} {
    %c0 = arith.constant 0 : index
    %c0_0 = arith.constant 0 : index
    %0 = vector.load %arg2[%c0, %c0_0] : memref<11x96xf32, #tpu.memory_space<vmem>>, vector<11x96xf32>
    %c0_1 = arith.constant 0 : index
    %c0_2 = arith.constant 0 : index
    %1 = vector.load %arg3[%c0_1, %c0_2] : memref<32x96xf32, #tpu.memory_space<vmem>>, vector<32x96xf32>
    %c3 = arith.constant 3 : index
    %c0_3 = arith.constant 0 : index
    %c0_4 = arith.constant 0 : index
    %2 = vector.load %arg1[%c3, %c0_3, %c0_4] : memref<4x8x1xi32, #tpu.memory_space<vmem>>, vector<1x8x1xi32>
    %3 = vector.shape_cast %2 : vector<1x8x1xi32> to vector<8x1xi32>
    %4 = tpu.iota {dimensions = array<i32: 1>} : vector<8x11xi32>
    %c0_5 = arith.constant 0 : index
    %c0_6 = arith.constant 0 : index
    %c0_7 = arith.constant 0 : index
    %5 = vector.load %arg1[%c0_5, %c0_6, %c0_7] : memref<4x8x1xi32, #tpu.memory_space<vmem>>, vector<1x8x1xi32>
    %6 = vector.shape_cast %5 : vector<1x8x1xi32> to vector<8x1xi32>
    %7 = vector.broadcast %6 : vector<8x1xi32> to vector<8x11xi32>
    %8 = arith.cmpi eq, %7, %4 : vector<8x11xi32>
    %9 = arith.extui %8 : vector<8x11xi1> to vector<8x11xi32>
    %10 = arith.sitofp %9 : vector<8x11xi32> to vector<8x11xf32>
    %cst = arith.constant dense<0.000000e+00> : vector<8x96xf32>
    %11 = tpu.matmul %10, %0, %cst {dimension_numbers = #tpu.dot_dimension_numbers<[1], [0], [0], [1], [0, 0, 1, 1], [], []>} : vector<8x11xf32>, vector<11x96xf32>, vector<8x96xf32> -> vector<8x96xf32>
    %c1 = arith.constant 1 : index
    %c0_8 = arith.constant 0 : index
    %c0_9 = arith.constant 0 : index
    %12 = vector.load %arg1[%c1, %c0_8, %c0_9] : memref<4x8x1xi32, #tpu.memory_space<vmem>>, vector<1x8x1xi32>
    %13 = vector.shape_cast %12 : vector<1x8x1xi32> to vector<8x1xi32>
    %14 = vector.broadcast %13 : vector<8x1xi32> to vector<8x11xi32>
    %15 = arith.cmpi eq, %14, %4 : vector<8x11xi32>
    %16 = arith.extui %15 : vector<8x11xi1> to vector<8x11xi32>
    %17 = arith.sitofp %16 : vector<8x11xi32> to vector<8x11xf32>
    %cst_10 = arith.constant dense<0.000000e+00> : vector<8x96xf32>
    %18 = tpu.matmul %17, %0, %cst_10 {dimension_numbers = #tpu.dot_dimension_numbers<[1], [0], [0], [1], [0, 0, 1, 1], [], []>} : vector<8x11xf32>, vector<11x96xf32>, vector<8x96xf32> -> vector<8x96xf32>
    %c2 = arith.constant 2 : index
    %c0_11 = arith.constant 0 : index
    %c0_12 = arith.constant 0 : index
    %19 = vector.load %arg1[%c2, %c0_11, %c0_12] : memref<4x8x1xi32, #tpu.memory_space<vmem>>, vector<1x8x1xi32>
    %20 = vector.shape_cast %19 : vector<1x8x1xi32> to vector<8x1xi32>
    %21 = vector.broadcast %20 : vector<8x1xi32> to vector<8x11xi32>
    %22 = arith.cmpi eq, %21, %4 : vector<8x11xi32>
    %23 = arith.extui %22 : vector<8x11xi1> to vector<8x11xi32>
    %24 = arith.sitofp %23 : vector<8x11xi32> to vector<8x11xf32>
    %cst_13 = arith.constant dense<0.000000e+00> : vector<8x96xf32>
    %25 = tpu.matmul %24, %0, %cst_13 {dimension_numbers = #tpu.dot_dimension_numbers<[1], [0], [0], [1], [0, 0, 1, 1], [], []>} : vector<8x11xf32>, vector<11x96xf32>, vector<8x96xf32> -> vector<8x96xf32>
    %c0_14 = arith.constant 0 : index
    %c0_15 = arith.constant 0 : index
    %26 = vector.load %arg4[%c0_14, %c0_15] : memref<1x32xf32, #tpu.memory_space<vmem>>, vector<1x32xf32>
    %27 = vector.shape_cast %26 : vector<1x32xf32> to vector<1x32xf32>
    %28 = vector.broadcast %27 : vector<1x32xf32> to vector<8x32xf32>
    %cst_16 = arith.constant 0.000000e+00 : f32
    %29 = vector.broadcast %cst_16 : f32 to vector<8x32xf32>
    %cst_17 = arith.constant 0.000000e+00 : f32
    %30 = vector.broadcast %cst_17 : f32 to vector<8x32xf32>
    %cst_18 = arith.constant dense<0.000000e+00> : vector<8x96xf32>
    %31 = tpu.matmul %29, %1, %cst_18 {dimension_numbers = #tpu.dot_dimension_numbers<[1], [0], [0], [1], [0, 0, 1, 1], [], []>} : vector<8x32xf32>, vector<32x96xf32>, vector<8x96xf32> -> vector<8x96xf32>
    %32 = vector.extract_strided_slice %11 {offsets = [0, 0], sizes = [8, 32], strides = [1, 1]} : vector<8x96xf32> to vector<8x32xf32>
    %33 = vector.extract_strided_slice %31 {offsets = [0, 0], sizes = [8, 32], strides = [1, 1]} : vector<8x96xf32> to vector<8x32xf32>
    %34 = arith.addf %32, %33 : vector<8x32xf32>
    %cst_19 = arith.constant 5.000000e-01 : f32
    %35 = vector.broadcast %cst_19 : f32 to vector<8x32xf32>
    %36 = arith.mulf %35, %34 : vector<8x32xf32>
    %37 = math.tanh %36 : vector<8x32xf32>
    %cst_20 = arith.constant 1.000000e+00 : f32
    %38 = vector.broadcast %cst_20 : f32 to vector<8x32xf32>
    %39 = arith.addf %37, %38 : vector<8x32xf32>
    %cst_21 = arith.constant 5.000000e-01 : f32
    %40 = vector.broadcast %cst_21 : f32 to vector<8x32xf32>
    %41 = arith.mulf %40, %39 : vector<8x32xf32>
    %42 = vector.extract_strided_slice %11 {offsets = [0, 32], sizes = [8, 32], strides = [1, 1]} : vector<8x96xf32> to vector<8x32xf32>
    %43 = vector.extract_strided_slice %31 {offsets = [0, 32], sizes = [8, 32], strides = [1, 1]} : vector<8x96xf32> to vector<8x32xf32>
    %44 = arith.addf %42, %43 : vector<8x32xf32>
    %cst_22 = arith.constant 5.000000e-01 : f32
    %45 = vector.broadcast %cst_22 : f32 to vector<8x32xf32>
    %46 = arith.mulf %45, %44 : vector<8x32xf32>
    %47 = math.tanh %46 : vector<8x32xf32>
    %cst_23 = arith.constant 1.000000e+00 : f32
    %48 = vector.broadcast %cst_23 : f32 to vector<8x32xf32>
    %49 = arith.addf %47, %48 : vector<8x32xf32>
    %cst_24 = arith.constant 5.000000e-01 : f32
    %50 = vector.broadcast %cst_24 : f32 to vector<8x32xf32>
    %51 = arith.mulf %50, %49 : vector<8x32xf32>
    %52 = vector.extract_strided_slice %11 {offsets = [0, 64], sizes = [8, 32], strides = [1, 1]} : vector<8x96xf32> to vector<8x32xf32>
    %53 = vector.extract_strided_slice %31 {offsets = [0, 64], sizes = [8, 32], strides = [1, 1]} : vector<8x96xf32> to vector<8x32xf32>
    %54 = arith.addf %53, %28 : vector<8x32xf32>
    %55 = arith.mulf %41, %54 : vector<8x32xf32>
    %56 = arith.addf %52, %55 : vector<8x32xf32>
    %57 = math.tanh %56 : vector<8x32xf32>
    %cst_25 = arith.constant 1.000000e+00 : f32
    %58 = vector.broadcast %cst_25 : f32 to vector<8x32xf32>
    %59 = arith.subf %58, %51 : vector<8x32xf32>
    %60 = arith.mulf %59, %57 : vector<8x32xf32>
    %61 = arith.mulf %51, %29 : vector<8x32xf32>
    %62 = arith.addf %60, %61 : vector<8x32xf32>
    %c0_i32 = arith.constant 0 : i32
    %63 = vector.broadcast %c0_i32 : i32 to vector<8x1xi32>
    %64 = arith.cmpi eq, %3, %63 : vector<8x1xi32>
    %65 = vector.shape_cast %64 : vector<8x1xi1> to vector<8x1xi1>
    %66 = vector.broadcast %65 : vector<8x1xi1> to vector<8x32xi1>
    %67 = arith.select %66, %62, %30 : vector<8x32xi1>, vector<8x32xf32>
    %cst_26 = arith.constant dense<0.000000e+00> : vector<8x96xf32>
    %68 = tpu.matmul %62, %1, %cst_26 {dimension_numbers = #tpu.dot_dimension_numbers<[1], [0], [0], [1], [0, 0, 1, 1], [], []>} : vector<8x32xf32>, vector<32x96xf32>, vector<8x96xf32> -> vector<8x96xf32>
    %69 = vector.extract_strided_slice %18 {offsets = [0, 0], sizes = [8, 32], strides = [1, 1]} : vector<8x96xf32> to vector<8x32xf32>
    %70 = vector.extract_strided_slice %68 {offsets = [0, 0], sizes = [8, 32], strides = [1, 1]} : vector<8x96xf32> to vector<8x32xf32>
    %71 = arith.addf %69, %70 : vector<8x32xf32>
    %cst_27 = arith.constant 5.000000e-01 : f32
    %72 = vector.broadcast %cst_27 : f32 to vector<8x32xf32>
    %73 = arith.mulf %72, %71 : vector<8x32xf32>
    %74 = math.tanh %73 : vector<8x32xf32>
    %cst_28 = arith.constant 1.000000e+00 : f32
    %75 = vector.broadcast %cst_28 : f32 to vector<8x32xf32>
    %76 = arith.addf %74, %75 : vector<8x32xf32>
    %cst_29 = arith.constant 5.000000e-01 : f32
    %77 = vector.broadcast %cst_29 : f32 to vector<8x32xf32>
    %78 = arith.mulf %77, %76 : vector<8x32xf32>
    %79 = vector.extract_strided_slice %18 {offsets = [0, 32], sizes = [8, 32], strides = [1, 1]} : vector<8x96xf32> to vector<8x32xf32>
    %80 = vector.extract_strided_slice %68 {offsets = [0, 32], sizes = [8, 32], strides = [1, 1]} : vector<8x96xf32> to vector<8x32xf32>
    %81 = arith.addf %79, %80 : vector<8x32xf32>
    %cst_30 = arith.constant 5.000000e-01 : f32
    %82 = vector.broadcast %cst_30 : f32 to vector<8x32xf32>
    %83 = arith.mulf %82, %81 : vector<8x32xf32>
    %84 = math.tanh %83 : vector<8x32xf32>
    %cst_31 = arith.constant 1.000000e+00 : f32
    %85 = vector.broadcast %cst_31 : f32 to vector<8x32xf32>
    %86 = arith.addf %84, %85 : vector<8x32xf32>
    %cst_32 = arith.constant 5.000000e-01 : f32
    %87 = vector.broadcast %cst_32 : f32 to vector<8x32xf32>
    %88 = arith.mulf %87, %86 : vector<8x32xf32>
    %89 = vector.extract_strided_slice %18 {offsets = [0, 64], sizes = [8, 32], strides = [1, 1]} : vector<8x96xf32> to vector<8x32xf32>
    %90 = vector.extract_strided_slice %68 {offsets = [0, 64], sizes = [8, 32], strides = [1, 1]} : vector<8x96xf32> to vector<8x32xf32>
    %91 = arith.addf %90, %28 : vector<8x32xf32>
    %92 = arith.mulf %78, %91 : vector<8x32xf32>
    %93 = arith.addf %89, %92 : vector<8x32xf32>
    %94 = math.tanh %93 : vector<8x32xf32>
    %cst_33 = arith.constant 1.000000e+00 : f32
    %95 = vector.broadcast %cst_33 : f32 to vector<8x32xf32>
    %96 = arith.subf %95, %88 : vector<8x32xf32>
    %97 = arith.mulf %96, %94 : vector<8x32xf32>
    %98 = arith.mulf %88, %62 : vector<8x32xf32>
    %99 = arith.addf %97, %98 : vector<8x32xf32>
    %c1_i32 = arith.constant 1 : i32
    %100 = vector.broadcast %c1_i32 : i32 to vector<8x1xi32>
    %101 = arith.cmpi eq, %3, %100 : vector<8x1xi32>
    %102 = vector.shape_cast %101 : vector<8x1xi1> to vector<8x1xi1>
    %103 = vector.broadcast %102 : vector<8x1xi1> to vector<8x32xi1>
    %104 = arith.select %103, %99, %67 : vector<8x32xi1>, vector<8x32xf32>
    %cst_34 = arith.constant dense<0.000000e+00> : vector<8x96xf32>
    %105 = tpu.matmul %99, %1, %cst_34 {dimension_numbers = #tpu.dot_dimension_numbers<[1], [0], [0], [1], [0, 0, 1, 1], [], []>} : vector<8x32xf32>, vector<32x96xf32>, vector<8x96xf32> -> vector<8x96xf32>
    %106 = vector.extract_strided_slice %25 {offsets = [0, 0], sizes = [8, 32], strides = [1, 1]} : vector<8x96xf32> to vector<8x32xf32>
    %107 = vector.extract_strided_slice %105 {offsets = [0, 0], sizes = [8, 32], strides = [1, 1]} : vector<8x96xf32> to vector<8x32xf32>
    %108 = arith.addf %106, %107 : vector<8x32xf32>
    %cst_35 = arith.constant 5.000000e-01 : f32
    %109 = vector.broadcast %cst_35 : f32 to vector<8x32xf32>
    %110 = arith.mulf %109, %108 : vector<8x32xf32>
    %111 = math.tanh %110 : vector<8x32xf32>
    %cst_36 = arith.constant 1.000000e+00 : f32
    %112 = vector.broadcast %cst_36 : f32 to vector<8x32xf32>
    %113 = arith.addf %111, %112 : vector<8x32xf32>
    %cst_37 = arith.constant 5.000000e-01 : f32
    %114 = vector.broadcast %cst_37 : f32 to vector<8x32xf32>
    %115 = arith.mulf %114, %113 : vector<8x32xf32>
    %116 = vector.extract_strided_slice %25 {offsets = [0, 32], sizes = [8, 32], strides = [1, 1]} : vector<8x96xf32> to vector<8x32xf32>
    %117 = vector.extract_strided_slice %105 {offsets = [0, 32], sizes = [8, 32], strides = [1, 1]} : vector<8x96xf32> to vector<8x32xf32>
    %118 = arith.addf %116, %117 : vector<8x32xf32>
    %cst_38 = arith.constant 5.000000e-01 : f32
    %119 = vector.broadcast %cst_38 : f32 to vector<8x32xf32>
    %120 = arith.mulf %119, %118 : vector<8x32xf32>
    %121 = math.tanh %120 : vector<8x32xf32>
    %cst_39 = arith.constant 1.000000e+00 : f32
    %122 = vector.broadcast %cst_39 : f32 to vector<8x32xf32>
    %123 = arith.addf %121, %122 : vector<8x32xf32>
    %cst_40 = arith.constant 5.000000e-01 : f32
    %124 = vector.broadcast %cst_40 : f32 to vector<8x32xf32>
    %125 = arith.mulf %124, %123 : vector<8x32xf32>
    %126 = vector.extract_strided_slice %25 {offsets = [0, 64], sizes = [8, 32], strides = [1, 1]} : vector<8x96xf32> to vector<8x32xf32>
    %127 = vector.extract_strided_slice %105 {offsets = [0, 64], sizes = [8, 32], strides = [1, 1]} : vector<8x96xf32> to vector<8x32xf32>
    %128 = arith.addf %127, %28 : vector<8x32xf32>
    %129 = arith.mulf %115, %128 : vector<8x32xf32>
    %130 = arith.addf %126, %129 : vector<8x32xf32>
    %131 = math.tanh %130 : vector<8x32xf32>
    %cst_41 = arith.constant 1.000000e+00 : f32
    %132 = vector.broadcast %cst_41 : f32 to vector<8x32xf32>
    %133 = arith.subf %132, %125 : vector<8x32xf32>
    %134 = arith.mulf %133, %131 : vector<8x32xf32>
    %135 = arith.mulf %125, %99 : vector<8x32xf32>
    %136 = arith.addf %134, %135 : vector<8x32xf32>
    %c2_i32 = arith.constant 2 : i32
    %137 = vector.broadcast %c2_i32 : i32 to vector<8x1xi32>
    %138 = arith.cmpi eq, %3, %137 : vector<8x1xi32>
    %139 = vector.shape_cast %138 : vector<8x1xi1> to vector<8x1xi1>
    %140 = vector.broadcast %139 : vector<8x1xi1> to vector<8x32xi1>
    %141 = arith.select %140, %136, %104 : vector<8x32xi1>, vector<8x32xf32>
    %c0_42 = arith.constant 0 : index
    %c0_43 = arith.constant 0 : index
    %142 = vector.load %arg5[%c0_42, %c0_43] : memref<8x32xf32, #tpu.memory_space<vmem>>, vector<8x32xf32>
    tpu.vector_store %arg5[%c0_42, %c0_43], %141 {strides = array<i32>} : memref<8x32xf32, #tpu.memory_space<vmem>>, vector<8x32xf32>,
    return
  }
  func.func @transform_0(%arg0: i32) -> (i32, i32, i32) {
    %c0_i32 = arith.constant 0 : i32
    %c0_i32_0 = arith.constant 0 : i32
    %c0_i32_1 = arith.constant 0 : i32
    return %c0_i32, %arg0, %c0_i32_0 : i32, i32, i32
  }
  func.func @transform_1(%arg0: i32) -> (i32, i32) {
    %c0_i32 = arith.constant 0 : i32
    %c0_i32_0 = arith.constant 0 : i32
    %c0_i32_1 = arith.constant 0 : i32
    return %c0_i32, %c0_i32_0 : i32, i32
  }
  func.func @transform_2(%arg0: i32) -> (i32, i32) {
    %c0_i32 = arith.constant 0 : i32
    %c0_i32_0 = arith.constant 0 : i32
    %c0_i32_1 = arith.constant 0 : i32
    return %c0_i32, %c0_i32_0 : i32, i32
  }
  func.func @transform_3(%arg0: i32) -> (i32, i32) {
    %c0_i32 = arith.constant 0 : i32
    %c0_i32_0 = arith.constant 0 : i32
    %c0_i32_1 = arith.constant 0 : i32
    return %c0_i32, %c0_i32_0 : i32, i32
  }
  func.func @transform_4(%arg0: i32) -> (i32, i32) {
    %c0_i32 = arith.constant 0 : i32
    %c0_i32_0 = arith.constant 0 : i32
    return %arg0, %c0_i32 : i32, i32
  }
}

</mosaic_0001>

<bundles_post_ra>
// kernel: tpu_custom_call.1
= control target key start
LH: loop header
LB: loop body
LE: loop exit
PB: predicated region body
PF: predicated region fallthrough
CT: control target
= control target key end

     0   :  { %9 = vsyncpa [#allocation3], 0  ;;  %s990_s0 = inlined_call_operand.vmem [shape: s32[4,8,1], index: 0, kind: input, shape index: {}]   ;;  %s991_s1 = inlined_call_operand.hbm [shape: f32[11,96], index: 1, kind: input, shape index: {}]   ;;  %s992_s2 = inlined_call_operand.vmem [shape: f32[32,96], index: 2, kind: input, shape index: {}]   ;;  %s993_s3 = inlined_call_operand.vmem [shape: f32[1,32], index: 3, kind: input, shape index: {}]   ;;  %s994_s4 = inlined_call_operand.hbm [shape: f32[8,32], index: 4, kind: output, shape index: {}]  }
   0x1   :  { %10 = vsyncpa [#allocation4], 0  ;;  %s834_s15 = smov [#allocation2]   ;;  %s786_s19 = scalar_lea.hbm %s991_s1, 256 }
   0x2   :  { %s18_s16 = sshll.u32 %s834_s15, 4  ;;  %p787_p0 = scmp.ne.s32.totalorder %s991_s1, %s786_s19  ;;  %s19_s16 = int_to_ptr.vmem [resolvable:$true] %s18_s16 }
   0x3   :  { %p790_p1 = scmp.lt.u32.totalorder %s786_s19, %s991_s1 }
   0x5   :  { %p792_p2 = pnand %p790_p1, %p787_p0 }
   0x7   :  { %795 = shalt.err (!%p792_p2)
}
   0x8   :  { %s796_s24 = scalar_lea.vmem %s19_s16, 256  ;;  %p801_p4 = scmp.lt.s32.totalorder %s19_s16, %s19_s16 }
   0x9   :  { %p797_p3 = scmp.ne.s32.totalorder %s19_s16, %s796_s24  ;;  %p802_p5 = scmp.lt.s32.totalorder %s796_s24, %s796_s24 }
   0xb   :  { %p803_p6 = por %p802_p5, %p801_p4 }
   0xd   :  { %p804_p7 = pnand %p803_p6, %p797_p3 }
   0xf   :  { %807 = shalt.err (!%p804_p7)
}
  0x10   :  { %s835_s25 = smov 128   ;;  %s836_s26 = smov 8  }
  0x11   :  { %24 = dma.hbm_to_vmem [thread:$0]  %s991_s1, 256, %s19_s16, [#allocation3], %s835_s25, %s835_s25, %s836_s26  }
  0x12   :  { %830 = dma.done.wait [#allocation3], 256  }
  0x13   :  { %831 = vsyncadd [#allocation3], 4294967040  ;;  %v837_v0 = vmov 0   ;;  %v838_v1 = vmov 0.0|0.0   ;;  %vm53_vm0 = vcmask 1042432   ;;  %v642_v2 = vld [vmem:[%s990_s0 + $0x8] sm:$0xff]  ;;  %v40_v10 = vlaneseq }
  0x14   :  { %772 = vset.pattern.permute.xlu0 %v837_v0  ;;  %735 = vmatprep.subr.bf16.mxu1 %v838_v1  ;;  %v32_v3 = vld [vmem:[#allocation2] sm:$0xff]  ;;  %v33_v4 = vld [vmem:[#allocation2 + $0x8] sm:$0x7]  ;;  %vm839_vm1 = vmmov 1   ;;  %vm840_vm3 = vmmov 0   ;;  %v841_v8 = vmov 0.0  }
  0x15   :  { %731 = vmatprep.subr.bf16.mxu0 %v838_v1  ;;  %773 = vset.pattern.permute.xlu1 %v837_v0  ;;  %vm889_vm2 = vmpackc.low %vm53_vm0, %vm839_vm1  ;;  %v42_v6 = vld [vmem:[%s990_s0] sm:$0xff]  ;;  %v732_v7 = vpack.c.bf16 %v33_v4, %v32_v3  ;;  %s842_s8 = smov 64   ;;  %v41_v11 = vand.u32 127, %v40_v10  ;;  %v35_v13 = vld [vmem:[%s992_s2 + $0x8] sm:$0xff]  ;;  %vm49_vm4 = vcmask 89088   ;;  %s843_s17 = smov 96  }
  0x16   :  { %130 = vperm.xlu0 %772, %v642_v2   ;;  %688 = vmatprep.mubr.msk.f32.mxu1 %vm840_vm3, %v841_v8  ;;  %v650_v9 = vld [vmem:[%s993_s3] ss:$0 sm:$0xff]  ;;  %v36_v16 = vld [vmem:[%s992_s2 + $0x10] sm:$0xff]  ;;  %v37_v17 = vld [vmem:[%s992_s2 + $0x18] sm:$0xff]  ;;  %vm295_vm8 = vcmask 261120  }
  0x17   :  { %681 = vmatprep.mubr.msk.f32.mxu0 %vm840_vm3, %v841_v8  ;;  %738 = vmatpush3.bf16.msk.msra.mxu1 %vm889_vm2, %v732_v7  ;;  %v34_v12 = vld [vmem:[%s992_s2] sm:$0xff]  ;;  %v747_v20 = vpack.c.bf16 %v37_v17, %v36_v16  ;;  %v646_v37 = vld [vmem:[%s990_s0 + $0x10] sm:$0xff] }
  0x18   :  { %734 = vmatpush3.bf16.msk.msra.mxu0 %vm889_vm2, %v732_v7  ;;  %743 = vmatprep.subr.bf16.mxu1 %v838_v1  ;;  %v744_v15 = vpack.c.bf16 %v35_v13, %v34_v12 }
  0x19   :  { %739 = vmatprep.subr.bf16.mxu0 %v838_v1  ;;  %374 = vrot.lane.b32.xlu1 %v650_v9, %s842_s8 }
  0x1a   :  { %44 = vperm.xlu0 %772, %v42_v6  }
  0x8b   :  { %v939_v26 = vpop.permute.xlu1 %374 }
  0x95   :  { %v131_v14 = vpop.permute.xlu0 %130 }
  0x96   :  { %vm132_vm5 = vcmp.eq.s32.totalorder %v131_v14, %v41_v11 }
  0x97   :  { %v643_v18 = vsel %vm132_vm5, 1.0, %v841_v8 }
  0x98   :  { %689 = vmatmul.mubr.msk.f32.vlgmr.msra.gmra.mrb[0].mxu1 %vm49_vm4, %v643_v18 }
  0x99   :  { %745 = vmatpush3.bf16.msra.mxu1 %v744_v15  ;;  %v45_v19 = vpop.permute.xlu0 %44  ;;  %706 = vmatprep.mubr.msk.f32.mxu1 %vm840_vm3, %v841_v8 }
  0x9a   :  { %vm46_vm6 = vcmp.eq.s32.totalorder %v45_v19, %v41_v11  ;;  %746 = vmatprep.subr.bf16.mxu1 %v838_v1 }
  0x9b   :  { %v639_v21 = vsel %vm46_vm6, 1.0, %v841_v8 }
  0x9c   :  { %682 = vmatmul.mubr.msk.f32.vlgmr.msra.gmra.mrb[0].mxu0 %vm49_vm4, %v639_v21 }
  0x9d   :  { %748 = vmatpush3.bf16.msra.mxu1 %v747_v20  ;;  %742 = vmatpush3.bf16.msk.msra.mxu0 %vm889_vm2, %v732_v7  ;;  %v638_v7 = vld [vmem:[%s990_s0 + $0x18] sm:$0xff]  ;;  %s844_s0 = smov [#allocation5]  }
  0x9e   :  { %695 = vmatprep.mubr.msk.f32.mxu0 %vm840_vm3, %v841_v8  ;;  %749 = vmatprep.subr.bf16.mxu0 %v838_v1  ;;  %vm397_vm9 = vcmp.eq.s32.totalorder %v638_v7, 0  ;;  %vm611_vm10 = vcmp.eq.s32.totalorder %v638_v7, 2  ;;  %vm504_vm11 = vcmp.eq.s32.totalorder %v638_v7, 1  ;;  %s629_s20 = sshll.u32 %s844_s0, 4  ;;  %s630_s20 = int_to_ptr.vmem [resolvable:$true] %s629_s20 }
  0x9f   :  { %755 = vmatprep.subr.bf16.mxu1 %v838_v1  ;;  %v398_v12 = vsel %vm397_vm9, 1, %v837_v0  ;;  %v612_v13 = vsel %vm611_vm10, 1, %v837_v0  ;;  %s808_s21 = scalar_lea.vmem %s630_s20, 128  ;;  %p813_p9 = scmp.lt.s32.totalorder %s630_s20, %s630_s20 }
  0xa0   :  { %707 = vmatmul.mubr.f32.vlgmr.msra.gmra.mrb[2].mxu1 %v841_v8  ;;  %p809_p8 = scmp.ne.s32.totalorder %s630_s20, %s808_s21  ;;  %p814_p10 = scmp.lt.s32.totalorder %s808_s21, %s808_s21 }
  0xa1   :  { %757 = vmatpush3.bf16.msra.mxu1 %v744_v15  ;;  %728 = vmatprep.mubr.msk.f32.mxu1 %vm840_vm3, %v841_v8 }
  0xa2   :  { %758 = vmatprep.subr.bf16.mxu1 %v838_v1  ;;  %p815_p11 = por %p814_p10, %p813_p9 }
  0xa4   :  { %p816_p12 = pnand %p815_p11, %p809_p8 }
  0xa5   :  { %760 = vmatpush3.bf16.msra.mxu1 %v747_v20 }
 0x16b   :  { %v204_v22 = vpop.f32.mrb[0].mxu1 }
 0x16c   :  { %v690_v23 = vpop.f32.mrb[1].mxu1 }
 0x16f   :  { %v123_v24 = vpop.f32.mrb[0].mxu0 }
 0x170   :  { %v683_v25 = vpop.f32.mrb[1].mxu0 }
 0x173   :  { %v365_v27 = vpop.f32.mrb[2].mxu1 }
 0x174   :  { %v369_v28 = vadd.f32 %v365_v27, %v123_v24  ;;  %v377_v29 = vadd.f32 %v939_v26, %v365_v27  ;;  %v708_v30 = vpop.f32.mrb[3].mxu1 }
 0x176   :  { %379 = vrot.lane.b32.xlu1 %v377_v29, %s842_s8  ;;  %v370_v31 = vmul.f32 0.5, %v369_v28 }
 0x178   :  { %774 = vtanh.f32 %v370_v31 }
 0x182   :  { %v775_v32 = vpop.eup %774 }
 0x183   :  { %v372_v33 = vadd.f32 1.0, %v775_v32 }
 0x185   :  { %v373_v34 = vmul.f32 0.5, %v372_v33 }
 0x187   :  { %v389_v43 = vsub.f32 1.0, %v373_v34  ;;  %v395_v45 = vmul.f32 0.0, %v373_v34 }
 0x1e8   :  { %v380_v35 = vpop.permute.xlu1 %379 }
 0x1e9   :  { %v382_v36 = vmul.f32 %v380_v35, %v373_v34 }
 0x1eb   :  { %384 = vrot.lane.b32.xlu0 %v382_v36, %s842_s8 }
 0x1ef   :  { %211 = vperm.xlu0 %772, %v646_v37  }
 0x25d   :  { %v385_v38 = vpop.permute.xlu0 %384 }
 0x25e   :  { %v387_v39 = vadd.f32 %v385_v38, %v123_v24 }
 0x260   :  { %776 = vtanh.f32 %v387_v39 }
 0x26a   :  { %v777_v40 = vpop.eup %776 }
 0x26b   :  { %391 = vrot.lane.b32.xlu1 %v777_v40, %s843_s17 }
 0x26e   :  { %v212_v41 = vpop.permute.xlu0 %211 }
 0x26f   :  { %vm213_vm7 = vcmp.eq.s32.totalorder %v212_v41, %v41_v11 }
 0x270   :  { %v647_v42 = vsel %vm213_vm7, 1.0, %v841_v8 }
 0x271   :  { %696 = vmatmul.mubr.msk.f32.vlgmr.msra.gmra.mrb[2].mxu0 %vm49_vm4, %v647_v42 }
 0x272   :  { %751 = vmatpush3.bf16.msra.mxu0 %v744_v15  ;;  %717 = vmatprep.mubr.msk.f32.mxu0 %vm840_vm3, %v841_v8 }
 0x273   :  { %752 = vmatprep.subr.bf16.mxu0 %v838_v1 }
 0x276   :  { %754 = vmatpush3.bf16.msra.mxu0 %v747_v20  ;;  %v505_v20 = vsel %vm504_vm11, 1, %v837_v0 }
 0x2dd   :  { %v392_v44 = vpop.permute.xlu1 %391 }
 0x2de   :  { %v394_v46 = vmul.f32 %v392_v44, %v389_v43 }
 0x2e0   :  { %v953_v47 = vadd.f32 %v395_v45, %v394_v46 }
 0x2e2   :  { %405 = vrot.lane.b32.xlu1 %v953_v47, %s843_s17 }
 0x344   :  { %v285_v48 = vpop.f32.mrb[2].mxu0 }
 0x345   :  { %v697_v49 = vpop.f32.mrb[3].mxu0 }
 0x354   :  { %v406_v50 = vpop.permute.xlu1 %405 }
 0x355   :  { %718 = vmatmul.mubr.msk.f32.vlgmr.msra.gmra.mrb[4].mxu0 %vm295_vm8, %v406_v50 }
 0x428   :  { %v475_v51 = vpop.f32.mrb[4].mxu0 }
 0x429   :  { %v479_v52 = vadd.f32 %v475_v51, %v204_v22  ;;  %v484_v53 = vadd.f32 %v475_v51, %v939_v26  ;;  %v719_v54 = vpop.f32.mrb[5].mxu0 }
 0x42b   :  { %486 = vrot.lane.b32.xlu0 %v484_v53, %s842_s8  ;;  %v480_v55 = vmul.f32 0.5, %v479_v52 }
 0x42d   :  { %778 = vtanh.f32 %v480_v55 }
 0x437   :  { %v779_v56 = vpop.eup %778 }
 0x438   :  { %v482_v57 = vadd.f32 1.0, %v779_v56 }
 0x43a   :  { %v483_v58 = vmul.f32 0.5, %v482_v57 }
 0x43c   :  { %v496_v1 = vsub.f32 1.0, %v483_v58  ;;  %v502_v3 = vmul.f32 %v483_v58, %v953_v47 }
 0x49d   :  { %v487_v59 = vpop.permute.xlu0 %486 }
 0x49e   :  { %v489_v60 = vmul.f32 %v487_v59, %v483_v58 }
 0x4a0   :  { %491 = vrot.lane.b32.xlu1 %v489_v60, %s842_s8 }
 0x512   :  { %v492_v61 = vpop.permute.xlu1 %491 }
 0x513   :  { %v494_v62 = vadd.f32 %v492_v61, %v204_v22 }
 0x515   :  { %780 = vtanh.f32 %v494_v62 }
 0x51f   :  { %v781_v63 = vpop.eup %780 }
 0x520   :  { %498 = vrot.lane.b32.xlu0 %v781_v63, %s843_s17 }
 0x592   :  { %v499_v2 = vpop.permute.xlu0 %498 }
 0x593   :  { %v501_v4 = vmul.f32 %v499_v2, %v496_v1 }
 0x595   :  { %v503_v5 = vadd.f32 %v502_v3, %v501_v4 }
 0x597   :  { %512 = vrot.lane.b32.xlu1 %v503_v5, %s843_s17 }
 0x609   :  { %v513_v6 = vpop.permute.xlu1 %512 }
 0x60a   :  { %729 = vmatmul.mubr.msk.f32.vlgmr.msra.gmra.mrb[4].mxu1 %vm295_vm8, %v513_v6 }
 0x6dd   :  { %v582_v8 = vpop.f32.mrb[4].mxu1 }
 0x6de   :  { %v586_v9 = vadd.f32 %v582_v8, %v285_v48  ;;  %v591_v10 = vadd.f32 %v582_v8, %v939_v26  ;;  %v730_v11 = vpop.f32.mrb[5].mxu1 }
 0x6e0   :  { %593 = vrot.lane.b32.xlu0 %v591_v10, %s842_s8  ;;  %v587_v14 = vmul.f32 0.5, %v586_v9 }
 0x6e2   :  { %782 = vtanh.f32 %v587_v14 }
 0x6e4   :  { %400 = vperm.xlu0 %772, %v398_v12  }
 0x6e8   :  { %614 = vperm.xlu0 %772, %v612_v13  }
 0x6ec   :  { %v783_v15 = vpop.eup %782 }
 0x6ed   :  { %v589_v16 = vadd.f32 1.0, %v783_v15 }
 0x6ef   :  { %v590_v17 = vmul.f32 0.5, %v589_v16 }
 0x6f1   :  { %v603_v26 = vsub.f32 1.0, %v590_v17  ;;  %v609_v29 = vmul.f32 %v590_v17, %v503_v5 }
 0x752   :  { %v594_v18 = vpop.permute.xlu0 %593 }
 0x753   :  { %v596_v19 = vmul.f32 %v594_v18, %v590_v17 }
 0x755   :  { %598 = vrot.lane.b32.xlu1 %v596_v19, %s842_s8 }
 0x759   :  { %507 = vperm.xlu1 %773, %v505_v20  }
 0x763   :  { %v401_v24 = vpop.permute.xlu0 %400 }
 0x764   :  { %vm402_vm12 = vcmp.eq.s32.totalorder %v401_v24, 1 }
 0x765   :  { %v403_v31 = vsel %vm402_vm12, %v953_v47, 0.0 }
 0x767   :  { %v615_v28 = vpop.permute.xlu0 %614 }
 0x768   :  { %vm616_vm14 = vcmp.eq.s32.totalorder %v615_v28, 1 }
 0x7c7   :  { %v599_v21 = vpop.permute.xlu1 %598 }
 0x7c8   :  { %v601_v22 = vadd.f32 %v599_v21, %v285_v48 }
 0x7ca   :  { %784 = vtanh.f32 %v601_v22 }
 0x7d4   :  { %v785_v23 = vpop.eup %784 }
 0x7d5   :  { %605 = vrot.lane.b32.xlu1 %v785_v23, %s843_s17 }
 0x7d8   :  { %v508_v25 = vpop.permute.xlu1 %507 }
 0x7d9   :  { %vm509_vm13 = vcmp.eq.s32.totalorder %v508_v25, 1 }
 0x7da   :  { %v510_v0 = vsel %vm509_vm13, %v503_v5, %v403_v31 }
 0x847   :  { %v606_v27 = vpop.permute.xlu1 %605 }
 0x848   :  { %v608_v30 = vmul.f32 %v606_v27, %v603_v26 }
 0x84a   :  { %v610_v32 = vadd.f32 %v609_v29, %v608_v30 }
 0x84c   :  { %v617_v33 = vsel %vm616_vm14, %v610_v32, %v510_v0 }
 0x84d   :  { %619 = vrot.lane.b32.xlu0 %v617_v33, %s843_s17 }
 0x8bf   :  { %v620_v34 = vpop.permute.xlu0 %619 }
 0x8c0   :  { %622 = vst.msk [vmem:[#allocation5] sm:$0xff] %vm295_vm8, %v620_v34 }
 0x8c1   :  { %819 = shalt.err (!%p816_p12)
}
 0x8c2   :  { %s820_s24 = scalar_lea.hbm %s994_s4, 128 }
 0x8c3   :  { %p821_p13 = scmp.ne.s32.totalorder %s994_s4, %s820_s24  ;;  %p824_p0 = scmp.lt.u32.totalorder %s820_s24, %s994_s4 }
 0x8c5   :  { %p826_p1 = pnand %p824_p0, %p821_p13 }
 0x8c7   :  { %829 = shalt.err (!%p826_p1)
}
 0x8c8   :  { %632 = dma.vmem_to_hbm [thread:$0]  %s630_s20, 128, %s994_s4, [#allocation4]  }
 0x8c9   :  { %832 = dma.done.wait [#allocation4], 128  }
 0x8ca   :  { %833 = vsyncadd [#allocation4], 4294967168 }
 0x8cb   :  { %636 = vsyncpa [#allocation3], 1 }
 0x8cc   :  { %637 = vsyncpa [#allocation4], 1 }

</bundles_post_ra>
